<compile_context>
chip_gen: v7x
topology: tpu7x:2x2x1
jax: 0.10.0
libtpu: 0.0.40
codegen_flags: <defaults>
</compile_context>

<pallas_src>
import functools

import jax
import jax.numpy as jnp
from jax.experimental import pallas as pl
from jax.experimental.pallas import tpu as pltpu

_LANE = 128
_SUBLANE = 8


def _shortcut_kernel(x_ref, o_ref, *, pad_rows, copy_rows, wo):
    """Fused stride-2 subsample + zero channel pad.

    x_ref: (nb, C*Ho, 2*W)   row k = [spatial row 2*h | spatial row 2*h+1]
    o_ref: (nb, (C + 2*pad)*Ho, Wo)
    """
    nb = x_ref.shape[0]
    w2 = x_ref.shape[2]                     # = 2*W

    # Lane-compaction matrix: sel[i, j] = 1 iff i == 2*j.  Column 2*j always
    # lands in the first half of the packed row-pair, so one matmul does both
    # "take even spatial row" and "take even columns".  Exact 0/1 weights +
    # HIGHEST precision keep the copy bit-accurate; the MXU is idle here so the
    # matmul is hidden under the HBM DMA bound.
    ri = jax.lax.broadcasted_iota(jnp.int32, (w2, wo), 0)
    ci = jax.lax.broadcasted_iota(jnp.int32, (w2, wo), 1)
    sel = (ri == 2 * ci).astype(jnp.float32)

    if pad_rows > 0:
        zeros = jnp.zeros((nb, pad_rows, wo), dtype=o_ref.dtype)
        o_ref[:, :pad_rows, :] = zeros                      # low channel pad
        o_ref[:, pad_rows + copy_rows:, :] = zeros          # high channel pad

    for n in range(nb):        # nb is small & static -> unrolled, LLO-visible
        img = x_ref[n].astype(jnp.float32)                  # (C*Ho, 2W)
        sub = jnp.dot(img, sel,
                      precision=jax.lax.Precision.HIGHEST,
                      preferred_element_type=jnp.float32)   # (C*Ho, Wo)
        o_ref[n, pl.ds(pad_rows, copy_rows), :] = sub.astype(o_ref.dtype)


def _vmem_tile_bytes(rows, cols, itemsize):
    """(8,128)-padded VMEM footprint of a (rows, cols) slab."""
    pr = -(-rows // _SUBLANE) * _SUBLANE
    pc = -(-cols // _LANE) * _LANE
    return pr * pc * itemsize


def lambda_layer_ref(x, planes):
    """Pure-JAX reference of the PyTorch option-A shortcut lambda."""
    pad = planes // 4
    y = x[:, :, ::2, ::2]
    return jnp.pad(y, ((0, 0), (pad, pad), (0, 0), (0, 0)))


def lambda_layer(x, planes, use_pallas=None):
    """Option-A shortcut lambda as a Pallas TPU kernel.

    x: (N, C, H, W) NCHW.  pad = planes // 4 channels of zeros on each side.
    use_pallas: None -> auto dispatch (XLA path for pad==0 / tiny tensors),
                True/False -> force.
    """
    N, C, H, W = x.shape
    pad = planes // 4
    C_out = C + 2 * pad
    Ho, Wo = -(-H // 2), -(-W // 2)          # ceil: matches x[:, :, ::2, ::2]
    itemsize = jnp.dtype(x.dtype).itemsize

    # TODO(synk): odd H would need per-row handling; the canonical shortcut
    # always sees even H, so take the fused-XLA fallback there.
    if H % 2 != 0:
        return lambda_layer_ref(x, planes)

    in_bytes = N * C * H * W * itemsize
    out_bytes = N * C_out * Ho * Wo * itemsize
    if use_pallas is None:
        # pad == 0 is a pure strided copy, and tiny tensors are launch-overhead
        # dominated: XLA's fused slice+pad wins (and fuses with neighbors).
        use_pallas = pad > 0 and (in_bytes + out_bytes) >= (1 << 20)
    if not use_pallas:
        return lambda_layer_ref(x, planes)

    # ---- generation-aware blocking --------------------------------------
    kind = ""
    try:
        kind = jax.devices()[0].device_kind.lower()
    except Exception:
        pass
    two_tc = ("v7" in kind) or ("7x" in kind)        # v7x: 2 TCs, 64 MiB VMEM
    block_budget = (8 if two_tc else 16) * 1024 * 1024
    vmem_limit = (32 if two_tc else 64) * 1024 * 1024

    # Double-buffered VMEM footprint of one batch element (with layout padding).
    per_n = 2 * (_vmem_tile_bytes(C * Ho, 2 * W, itemsize)
                 + _vmem_tile_bytes(C_out * Ho, Wo, itemsize))
    if per_n > block_budget:
        # TODO(synk): add a second grid axis tiling Ho*Wo for huge images.
        return lambda_layer_ref(x, planes)

    nb = max(1, min(N, block_budget // per_n, 32))
    if two_tc and N >= 2:
        nb = min(nb, pl.cdiv(N, 2))      # keep >=2 parallel steps for 2 TCs
    steps = pl.cdiv(N, nb)               # ragged last block is masked by Pallas

    # Free reshape: pack each spatial row-pair into one row (H even).
    xm = x.reshape(N, C * Ho, 2 * W)
    pad_rows, copy_rows = pad * Ho, C * Ho

    kernel = functools.partial(_shortcut_kernel, pad_rows=pad_rows,
                               copy_rows=copy_rows, wo=Wo)

    cost = pl.CostEstimate(
        flops=2 * N * (C * Ho) * (2 * W) * Wo,
        transcendentals=0,
        bytes_accessed=in_bytes + out_bytes)

    out_m = pl.pallas_call(
        kernel,
        out_shape=jax.ShapeDtypeStruct((N, C_out * Ho, Wo), x.dtype),
        grid_spec=pltpu.PrefetchScalarGridSpec(
            num_scalar_prefetch=0,
            grid=(steps,),
            in_specs=[pl.BlockSpec((nb, C * Ho, 2 * W), lambda i: (i, 0, 0))],
            out_specs=pl.BlockSpec((nb, C_out * Ho, Wo), lambda i: (i, 0, 0)),
        ),
        compiler_params=pltpu.CompilerParams(
            dimension_semantics=("parallel",),
            vmem_limit_bytes=vmem_limit,
        ),
        cost_estimate=cost,
    )(xm)

    return out_m.reshape(N, C_out, Ho, Wo)


if __name__ == "__main__":
    key = jax.random.PRNGKey(0)
    # Small shapes consistent with a CIFAR ResNet block: N=2, C=4, H=W=16.
    x = jax.random.normal(key, (2, 4, 16, 16), dtype=jnp.float32)
    planes = 8  # next-block planes -> pad = 2 channels on each side

    out = jax.block_until_ready(lambda_layer(x, planes, use_pallas=True))
    ref = lambda_layer_ref(x, planes)

    assert out.shape == ref.shape, (out.shape, ref.shape)
    assert jnp.allclose(out, ref, rtol=1e-6, atol=1e-6), "mismatch vs reference"
    print("KERNEL_OK")
</pallas_src>

<mosaic_0001>
module attributes {stable_mosaic.version = 11 : i64} {
  func.func @_shortcut_kernel(%arg0: i32, %arg1: memref<2x32x32xf32, #tpu.memory_space<vmem>>, %arg2: memref<2x64x8xf32, #tpu.memory_space<vmem>>) attributes {dimension_semantics = [#tpu.dimension_semantics<parallel>], iteration_bounds = array<i64: 1>, scalar_prefetch = 0 : i64, scratch_operands = 0 : i64, tpu.core_type = #tpu.core_type<tc>, window_params = [{transform_indices = @transform_0, window_bounds = array<i64: 2, 32, 32>}, {transform_indices = @transform_1, window_bounds = array<i64: 2, 64, 8>}]} {
    %0 = tpu.iota {dimensions = array<i32: 0>} : vector<32x8xi32>
    %1 = tpu.iota {dimensions = array<i32: 1>} : vector<32x8xi32>
    %c2_i32 = arith.constant 2 : i32
    %2 = vector.broadcast %c2_i32 : i32 to vector<32x8xi32>
    %3 = arith.muli %2, %1 : vector<32x8xi32>
    %4 = arith.cmpi eq, %0, %3 : vector<32x8xi32>
    %5 = arith.extui %4 : vector<32x8xi1> to vector<32x8xi32>
    %6 = arith.sitofp %5 : vector<32x8xi32> to vector<32x8xf32>
    %cst = arith.constant 0.000000e+00 : f32
    %7 = vector.broadcast %cst : f32 to vector<2x16x8xf32>
    %c0 = arith.constant 0 : index
    %c0_0 = arith.constant 0 : index
    %c0_1 = arith.constant 0 : index
    %8 = vector.load %arg2[%c0, %c0_0, %c0_1] : memref<2x64x8xf32, #tpu.memory_space<vmem>>, vector<2x16x8xf32>
    tpu.vector_store %arg2[%c0, %c0_0, %c0_1], %7 {strides = array<i32>} : memref<2x64x8xf32, #tpu.memory_space<vmem>>, vector<2x16x8xf32>,
    %c0_2 = arith.constant 0 : index
    %c48 = arith.constant 48 : index
    %c0_3 = arith.constant 0 : index
    %9 = vector.load %arg2[%c0_2, %c48, %c0_3] : memref<2x64x8xf32, #tpu.memory_space<vmem>>, vector<2x16x8xf32>
    tpu.vector_store %arg2[%c0_2, %c48, %c0_3], %7 {strides = array<i32>} : memref<2x64x8xf32, #tpu.memory_space<vmem>>, vector<2x16x8xf32>,
    %c0_4 = arith.constant 0 : index
    %c0_5 = arith.constant 0 : index
    %c0_6 = arith.constant 0 : index
    %10 = vector.load %arg1[%c0_4, %c0_5, %c0_6] : memref<2x32x32xf32, #tpu.memory_space<vmem>>, vector<1x32x32xf32>
    %11 = vector.shape_cast %10 : vector<1x32x32xf32> to vector<32x32xf32>
    %cst_7 = arith.constant dense<0.000000e+00> : vector<32x8xf32>
    %12 = tpu.matmul %11, %6, %cst_7 {dimension_numbers = #tpu.dot_dimension_numbers<[1], [0], [0], [1], [0, 0, 1, 1], [], []>, precision = #tpu.contract_precision<fp32>} : vector<32x32xf32>, vector<32x8xf32>, vector<32x8xf32> -> vector<32x8xf32>
    %c0_8 = arith.constant 0 : index
    %c16 = arith.constant 16 : index
    %c0_9 = arith.constant 0 : index
    %13 = vector.load %arg2[%c0_8, %c16, %c0_9] : memref<2x64x8xf32, #tpu.memory_space<vmem>>, vector<1x32x8xf32>
    %14 = vector.shape_cast %13 : vector<1x32x8xf32> to vector<32x8xf32>
    %15 = vector.shape_cast %12 : vector<32x8xf32> to vector<1x32x8xf32>
    tpu.vector_store %arg2[%c0_8, %c16, %c0_9], %15 {strides = array<i32>} : memref<2x64x8xf32, #tpu.memory_space<vmem>>, vector<1x32x8xf32>,
    %c1 = arith.constant 1 : index
    %c0_10 = arith.constant 0 : index
    %c0_11 = arith.constant 0 : index
    %16 = vector.load %arg1[%c1, %c0_10, %c0_11] : memref<2x32x32xf32, #tpu.memory_space<vmem>>, vector<1x32x32xf32>
    %17 = vector.shape_cast %16 : vector<1x32x32xf32> to vector<32x32xf32>
    %cst_12 = arith.constant dense<0.000000e+00> : vector<32x8xf32>
    %18 = tpu.matmul %17, %6, %cst_12 {dimension_numbers = #tpu.dot_dimension_numbers<[1], [0], [0], [1], [0, 0, 1, 1], [], []>, precision = #tpu.contract_precision<fp32>} : vector<32x32xf32>, vector<32x8xf32>, vector<32x8xf32> -> vector<32x8xf32>
    %c1_13 = arith.constant 1 : index
    %c16_14 = arith.constant 16 : index
    %c0_15 = arith.constant 0 : index
    %19 = vector.load %arg2[%c1_13, %c16_14, %c0_15] : memref<2x64x8xf32, #tpu.memory_space<vmem>>, vector<1x32x8xf32>
    %20 = vector.shape_cast %19 : vector<1x32x8xf32> to vector<32x8xf32>
    %21 = vector.shape_cast %18 : vector<32x8xf32> to vector<1x32x8xf32>
    tpu.vector_store %arg2[%c1_13, %c16_14, %c0_15], %21 {strides = array<i32>} : memref<2x64x8xf32, #tpu.memory_space<vmem>>, vector<1x32x8xf32>,
    return
  }
  func.func @transform_0(%arg0: i32) -> (i32, i32, i32) {
    %c0_i32 = arith.constant 0 : i32
    %c0_i32_0 = arith.constant 0 : i32
    %c0_i32_1 = arith.constant 0 : i32
    return %arg0, %c0_i32, %c0_i32_0 : i32, i32, i32
  }
  func.func @transform_1(%arg0: i32) -> (i32, i32, i32) {
    %c0_i32 = arith.constant 0 : i32
    %c0_i32_0 = arith.constant 0 : i32
    %c0_i32_1 = arith.constant 0 : i32
    return %arg0, %c0_i32, %c0_i32_0 : i32, i32, i32
  }
}

</mosaic_0001>

<bundles_post_ra>
// kernel: tpu_custom_call.1
= control target key start
LH: loop header
LB: loop body
LE: loop exit
PB: predicated region body
PF: predicated region fallthrough
CT: control target
= control target key end

     0   :  { %6 = vsyncpa [#allocation3], 0  ;;  %s2116_s0 = inlined_call_operand.hbm [shape: f32[2,32,32], index: 0, kind: input, shape index: {}]   ;;  %s2117_s1 = inlined_call_operand.hbm [shape: f32[2,64,8], index: 1, kind: output, shape index: {}]  }
   0x1   :  { %7 = vsyncpa [#allocation4], 0  ;;  %s1822_s6 = smov [#allocation2]   ;;  %s1774_s10 = scalar_lea.hbm %s2116_s0, 1024 }
   0x2   :  { %s13_s7 = sshll.u32 %s1822_s6, 4  ;;  %p1775_p0 = scmp.ne.s32.totalorder %s2116_s0, %s1774_s10  ;;  %s14_s7 = int_to_ptr.vmem [resolvable:$true] %s13_s7 }
   0x3   :  { %p1778_p1 = scmp.lt.u32.totalorder %s1774_s10, %s2116_s0 }
   0x5   :  { %p1780_p2 = pnand %p1778_p1, %p1775_p0 }
   0x7   :  { %1783 = shalt.err (!%p1780_p2)
}
   0x8   :  { %s1784_s15 = scalar_lea.vmem %s14_s7, 1024  ;;  %p1789_p4 = scmp.lt.s32.totalorder %s14_s7, %s14_s7 }
   0x9   :  { %p1785_p3 = scmp.ne.s32.totalorder %s14_s7, %s1784_s15  ;;  %p1790_p5 = scmp.lt.s32.totalorder %s1784_s15, %s1784_s15 }
   0xb   :  { %p1791_p6 = por %p1790_p5, %p1789_p4 }
   0xd   :  { %p1792_p7 = pnand %p1791_p6, %p1785_p3 }
   0xf   :  { %1795 = shalt.err (!%p1792_p7)
}
  0x10   :  { %s1823_s16 = smov 128   ;;  %s1824_s17 = smov 8  }
  0x11   :  { %19 = dma.hbm_to_vmem [thread:$0]  %s2116_s0, 1024, %s14_s7, [#allocation3], %s1823_s16, %s1823_s16, %s1824_s17  }
  0x12   :  { %1818 = dma.done.wait [#allocation3], 1024  }
  0x13   :  { %1819 = vsyncadd [#allocation3], 4294966272  ;;  %v23_v0 = vlaneseq  ;;  %vm43_vm0 = vcmask 64512   ;;  %v1825_v3 = vmov 0.0   ;;  %vm56_vm1 = vcmask 261120   ;;  %v52_v9 = vld [vmem:[#allocation2] sm:$0xff] }
  0x14   :  { %44 = vst.msk [vmem:[#allocation5] sm:$0xff] %vm43_vm0, %v1825_v3  ;;  %45 = vst.msk [vmem:[#allocation5 + $0x8] sm:$0xff] %vm43_vm0, %v1825_v3  ;;  %v688_v12 = vld [vmem:[#allocation2 + $0x20] sm:$0xff]  ;;  %v1826_v15 = vmov 1.0|1.0   ;;  %v58_v17 = vsel %vm56_vm1, %v52_v9, 0 }
  0x15   :  { %v24_v1 = vshrl.u32 %v23_v0, 7  ;;  %v29_v2 = vand.u32 127, %v23_v0  ;;  %46 = vst.msk [vmem:[#allocation5 + $0x40] sm:$0xff] %vm43_vm0, %v1825_v3  ;;  %47 = vst.msk [vmem:[#allocation5 + $0x48] sm:$0xff] %vm43_vm0, %v1825_v3  ;;  %v693_v20 = vsel %vm56_vm1, %v688_v12, 0  ;;  %v53_v21 = vld [vmem:[#allocation2 + $0x8] sm:$0xff] }
  0x16   :  { %48 = vst.msk [vmem:[#allocation5 + $0x30] sm:$0xff] %vm43_vm0, %v1825_v3  ;;  %49 = vst.msk [vmem:[#allocation5 + $0x38] sm:$0xff] %vm43_vm0, %v1825_v3  ;;  %v689_v22 = vld [vmem:[#allocation2 + $0x28] sm:$0xff]  ;;  %v1887_v23 = vand.u32 4294901760, %v58_v17  ;;  %v1889_v24 = vand.u32 4294901760, %v693_v20  ;;  %v61_v25 = vsel %vm56_vm1, %v53_v21, 0 }
  0x17   :  { %50 = vst.msk [vmem:[#allocation5 + $0x70] sm:$0xff] %vm43_vm0, %v1825_v3  ;;  %51 = vst.msk [vmem:[#allocation5 + $0x78] sm:$0xff] %vm43_vm0, %v1825_v3  ;;  %v25_v4 = vadd.s32 8, %v24_v1  ;;  %v30_v5 = vmul.u32 2, %v29_v2  ;;  %v26_v6 = vadd.s32 16, %v24_v1  ;;  %v27_v7 = vadd.s32 24, %v24_v1 }
  0x18   :  { %v696_v26 = vsel %vm56_vm1, %v689_v22, 0  ;;  %v54_v27 = vld [vmem:[#allocation2 + $0x10] sm:$0xff]  ;;  %v1901_v30 = vand.u32 4294901760, %v61_v25  ;;  %v1906_v32 = vsub.f32 %v58_v17, %v1887_v23  ;;  %v1909_v33 = vsub.f32 %v693_v20, %v1889_v24  ;;  %v55_v57 = vld [vmem:[#allocation2 + $0x18] sm:$0xff]  ;;  %s1827_s0 = smov [#allocation5]  }
  0x19   :  { %vm31_vm2 = vcmp.eq.s32.totalorder %v24_v1, %v30_v5  ;;  %vm32_vm3 = vcmp.eq.s32.totalorder %v25_v4, %v30_v5  ;;  %vm33_vm4 = vcmp.eq.s32.totalorder %v26_v6, %v30_v5  ;;  %vm34_vm5 = vcmp.eq.s32.totalorder %v27_v7, %v30_v5  ;;  %v690_v52 = vld [vmem:[#allocation2 + $0x30] sm:$0xff]  ;;  %v691_v58 = vld [vmem:[#allocation2 + $0x38] sm:$0xff]  ;;  %s1328_s20 = sshll.u32 %s1827_s0, 4  ;;  %s1329_s20 = int_to_ptr.vmem [resolvable:$true] %s1328_s20 }
  0x1a   :  { %vm1861_vm6 = vmpackc.low %vm32_vm3, %vm31_vm2  ;;  %v1340_v10 = vsel %vm31_vm2, 1.0, %v1825_v3  ;;  %v1341_v11 = vsel %vm32_vm3, 1.0, %v1825_v3  ;;  %v1342_v13 = vsel %vm33_vm4, 1.0, %v1825_v3  ;;  %v1343_v14 = vsel %vm34_vm5, 1.0, %v1825_v3  ;;  %s1796_s21 = scalar_lea.vmem %s1329_s20, 2048  ;;  %p1801_p9 = scmp.lt.s32.totalorder %s1329_s20, %s1329_s20 }
  0x1b   :  { %1633 = vmatprep.subr.msk.bf16.mxu0 %vm1861_vm6, %v1826_v15  ;;  %1681 = vmatprep.subr.msk.bf16.mxu1 %vm1861_vm6, %v1826_v15  ;;  %vm1871_vm7 = vmpackc.low %vm34_vm5, %vm33_vm4  ;;  %v1876_v18 = vsub.f32 %v1340_v10, %v1340_v10  ;;  %v1878_v19 = vsub.f32 %v1341_v11, %v1341_v11  ;;  %v1903_v31 = vand.u32 4294901760, %v696_v26  ;;  %v64_v34 = vsel %vm56_vm1, %v54_v27, 0  ;;  %p1797_p8 = scmp.ne.s32.totalorder %s1329_s20, %s1796_s21  ;;  %p1802_p10 = scmp.lt.s32.totalorder %s1796_s21, %s1796_s21 }
  0x1c   :  { %1635 = vmatpush3.bf16.msk.msra.mxu0 %vm1861_vm6, %v1826_v15  ;;  %1683 = vmatpush3.bf16.msk.msra.mxu1 %vm1861_vm6, %v1826_v15  ;;  %v1912_v35 = vsub.f32 %v1342_v13, %v1342_v13  ;;  %v1921_v38 = vsub.f32 %v61_v25, %v1901_v30  ;;  %v140_v40 = vand.u32 4294901760, %v1906_v32  ;;  %v775_v41 = vand.u32 4294901760, %v1909_v33 }
  0x1d   :  { %1637 = vmatprep.subr.msk.bf16.mxu0 %vm1871_vm7, %v1826_v15  ;;  %1685 = vmatprep.subr.msk.bf16.mxu1 %vm1871_vm7, %v1826_v15  ;;  %v181_v28 = vand.u32 4294901760, %v1876_v18  ;;  %v188_v29 = vand.u32 4294901760, %v1878_v19  ;;  %v1924_v39 = vsub.f32 %v696_v26, %v1903_v31  ;;  %v1934_v42 = vand.u32 4294901760, %v64_v34  ;;  %p1803_p11 = por %p1802_p10, %p1801_p9 }
  0x1e   :  { %v195_v43 = vand.u32 4294901760, %v1912_v35  ;;  %v150_v46 = vand.u32 4294901760, %v1921_v38  ;;  %v141_v48 = vsub.f32 %v1906_v32, %v140_v40  ;;  %v776_v49 = vsub.f32 %v1909_v33, %v775_v41 }
  0x1f   :  { %v182_v36 = vsub.f32 %v1876_v18, %v181_v28  ;;  %v189_v37 = vsub.f32 %v1878_v19, %v188_v29  ;;  %v785_v47 = vand.u32 4294901760, %v1924_v39  ;;  %v1946_v50 = vsub.f32 %v64_v34, %v1934_v42  ;;  %p1804_p12 = pnand %p1803_p11, %p1797_p8 }
  0x20   :  { %1639 = vmatpush3.bf16.msk.msra.mxu0 %vm1871_vm7, %v1826_v15  ;;  %1687 = vmatpush3.bf16.msk.msra.mxu1 %vm1871_vm7, %v1826_v15  ;;  %v196_v51 = vsub.f32 %v1912_v35, %v195_v43  ;;  %v151_v54 = vsub.f32 %v1921_v38, %v150_v46  ;;  %v1957_v56 = vsub.f32 %v1343_v14, %v1343_v14  ;;  %v142_v59 = vand.u32 4294901760, %v141_v48 }
  0x21   :  { %v183_v44 = vand.u32 4294901760, %v182_v36  ;;  %v190_v45 = vand.u32 4294901760, %v189_v37  ;;  %v786_v55 = vsub.f32 %v1924_v39, %v785_v47  ;;  %v777_v60 = vand.u32 4294901760, %v776_v49 }
  0x22   :  { %v160_v61 = vand.u32 4294901760, %v1946_v50  ;;  %v152_v62 = vand.u32 4294901760, %v151_v54  ;;  %v202_v0 = vand.u32 4294901760, %v1957_v56  ;;  %v699_v1 = vsel %vm56_vm1, %v690_v52, 0  ;;  %1472 = vmatprep.mubr.f32.mxu0 %v142_v59 }
  0x23   :  { %v1640_v53 = vpack.c.bf16 %v190_v45, %v183_v44  ;;  %v787_v63 = vand.u32 4294901760, %v786_v55  ;;  %1556 = vmatprep.mubr.f32.mxu1 %v777_v60  ;;  %v1965_v3 = vand.u32 4294901760, %v699_v1  ;;  %v67_v4 = vsel %vm56_vm1, %v55_v57, 0 }
  0x24   :  { %v161_v2 = vsub.f32 %v1946_v50, %v160_v61  ;;  %v702_v5 = vsel %vm56_vm1, %v691_v58, 0  ;;  %1473 = vmatmul.mubr.f32.vlgmr.msra.gmra.mrb[0].mxu0 %v152_v62  ;;  %v197_v6 = vand.u32 4294901760, %v196_v51  ;;  %v203_v7 = vsub.f32 %v1957_v56, %v202_v0 }
  0x25   :  { %1641 = vmatprep.subr.bf16.mxu0 %v1640_v53  ;;  %1689 = vmatprep.subr.bf16.mxu1 %v1640_v53  ;;  %v1972_v9 = vand.u32 4294901760, %v67_v4  ;;  %v1974_v10 = vand.u32 4294901760, %v702_v5  ;;  %v1977_v12 = vsub.f32 %v699_v1, %v1965_v3  ;;  %v1648_v26 = vpack.c.bf16 %v1878_v19, %v1876_v18 }
  0x26   :  { %1557 = vmatmul.mubr.f32.vlgmr.msra.gmra.mrb[0].mxu1 %v787_v63  ;;  %1643 = vmatpush3.bf16.msra.mxu0 %v1640_v53  ;;  %v162_v11 = vand.u32 4294901760, %v161_v2  ;;  %v204_v13 = vand.u32 4294901760, %v203_v7  ;;  %v1652_v48 = vpack.c.bf16 %v1957_v56, %v1912_v35  ;;  %v1664_v49 = vpack.c.bf16 %v188_v29, %v181_v28 }
  0x27   :  { %1691 = vmatpush3.bf16.msra.mxu1 %v1640_v53  ;;  %v1980_v14 = vsub.f32 %v67_v4, %v1972_v9  ;;  %v1983_v17 = vsub.f32 %v702_v5, %v1974_v10  ;;  %v795_v20 = vand.u32 4294901760, %v1977_v12  ;;  %v1668_v18 = vpack.c.bf16 %v202_v0, %v195_v43 }
  0x28   :  { %1475 = vmatprep.mubr.f32.mxu0 %v162_v11  ;;  %v1644_v21 = vpack.c.bf16 %v204_v13, %v197_v6 }
  0x29   :  { %v170_v22 = vand.u32 4294901760, %v1980_v14  ;;  %v805_v25 = vand.u32 4294901760, %v1983_v17  ;;  %v796_v27 = vsub.f32 %v1977_v12, %v795_v20 }
  0x2a   :  { %1645 = vmatprep.subr.bf16.mxu0 %v1644_v21  ;;  %1693 = vmatprep.subr.bf16.mxu1 %v1644_v21 }
  0x2b   :  { %v171_v34 = vsub.f32 %v1980_v14, %v170_v22  ;;  %v806_v36 = vsub.f32 %v1983_v17, %v805_v25  ;;  %v797_v37 = vand.u32 4294901760, %v796_v27  ;;  %1647 = vmatpush3.bf16.msra.mxu0 %v1644_v21  ;;  %1695 = vmatpush3.bf16.msra.mxu1 %v1644_v21 }
  0x2c   :  { %1649 = vmatprep.subr.bf16.mxu0 %v1648_v26  ;;  %1697 = vmatprep.subr.bf16.mxu1 %v1648_v26 }
  0x2d   :  { %v172_v44 = vand.u32 4294901760, %v171_v34  ;;  %v807_v45 = vand.u32 4294901760, %v806_v36  ;;  %1559 = vmatprep.mubr.f32.mxu1 %v797_v37 }
  0x2f   :  { %1476 = vmatmul.mubr.f32.gmra.mrb[2].mxu0 %v172_v44  ;;  %1560 = vmatmul.mubr.f32.gmra.mrb[2].mxu1 %v807_v45 }
  0x30   :  { %1486 = vmatprep.mubr.f32.mxu0 %v1887_v23  ;;  %1570 = vmatprep.mubr.f32.mxu1 %v1889_v24 }
  0x33   :  { %1487 = vmatmul.mubr.f32.vlgmr.msra.gmra.mrb[0].mxu0 %v1901_v30  ;;  %1571 = vmatmul.mubr.f32.vlgmr.msra.gmra.mrb[0].mxu1 %v1903_v31 }
  0x34   :  { %1651 = vmatpush3.bf16.msra.mxu0 %v1648_v26  ;;  %1699 = vmatpush3.bf16.msra.mxu1 %v1648_v26 }
  0x35   :  { %1489 = vmatprep.mubr.f32.mxu0 %v1934_v42  ;;  %1653 = vmatprep.subr.bf16.mxu0 %v1652_v48 }
  0x36   :  { %1573 = vmatprep.mubr.f32.mxu1 %v1965_v3  ;;  %1701 = vmatprep.subr.bf16.mxu1 %v1652_v48 }
  0x37   :  { %1490 = vmatmul.mubr.f32.gmra.mrb[2].mxu0 %v1972_v9  ;;  %1574 = vmatmul.mubr.f32.gmra.mrb[2].mxu1 %v1974_v10 }
  0x38   :  { %1655 = vmatpush3.bf16.msra.mxu0 %v1652_v48  ;;  %1703 = vmatpush3.bf16.msra.mxu1 %v1652_v48 }
  0x39   :  { %1500 = vmatprep.mubr.f32.mxu0 %v1906_v32  ;;  %1657 = vmatprep.subr.msk.bf16.mxu0 %vm1861_vm6, %v1826_v15 }
  0x3a   :  { %1584 = vmatprep.mubr.f32.mxu1 %v1909_v33  ;;  %1705 = vmatprep.subr.msk.bf16.mxu1 %vm1861_vm6, %v1826_v15 }
  0x3b   :  { %1501 = vmatmul.mubr.f32.vlgmr.msra.gmra.mrb[0].mxu0 %v1921_v38  ;;  %1585 = vmatmul.mubr.f32.vlgmr.msra.gmra.mrb[0].mxu1 %v1924_v39 }
  0x3c   :  { %1659 = vmatpush3.bf16.msk.msra.mxu0 %vm1861_vm6, %v1826_v15  ;;  %1707 = vmatpush3.bf16.msk.msra.mxu1 %vm1861_vm6, %v1826_v15 }
  0x3d   :  { %1503 = vmatprep.mubr.f32.mxu0 %v1946_v50  ;;  %1661 = vmatprep.subr.msk.bf16.mxu0 %vm1871_vm7, %v1826_v15 }
  0x3e   :  { %1587 = vmatprep.mubr.f32.mxu1 %v1977_v12  ;;  %1709 = vmatprep.subr.msk.bf16.mxu1 %vm1871_vm7, %v1826_v15 }
  0x3f   :  { %1504 = vmatmul.mubr.f32.gmra.mrb[2].mxu0 %v1980_v14  ;;  %1588 = vmatmul.mubr.f32.gmra.mrb[2].mxu1 %v1983_v17 }
  0x40   :  { %1663 = vmatpush3.bf16.msk.msra.mxu0 %vm1871_vm7, %v1826_v15  ;;  %1711 = vmatpush3.bf16.msk.msra.mxu1 %vm1871_vm7, %v1826_v15 }
  0x41   :  { %1514 = vmatprep.mubr.f32.mxu0 %v140_v40  ;;  %1665 = vmatprep.subr.bf16.mxu0 %v1664_v49 }
  0x42   :  { %1598 = vmatprep.mubr.f32.mxu1 %v775_v41  ;;  %1713 = vmatprep.subr.bf16.mxu1 %v1664_v49 }
  0x43   :  { %1515 = vmatmul.mubr.f32.vlgmr.msra.gmra.mrb[0].mxu0 %v150_v46  ;;  %1599 = vmatmul.mubr.f32.vlgmr.msra.gmra.mrb[0].mxu1 %v785_v47 }
  0x44   :  { %1667 = vmatpush3.bf16.msra.mxu0 %v1664_v49  ;;  %1715 = vmatpush3.bf16.msra.mxu1 %v1664_v49 }
  0x45   :  { %1517 = vmatprep.mubr.f32.mxu0 %v160_v61  ;;  %1669 = vmatprep.subr.bf16.mxu0 %v1668_v18 }
  0x46   :  { %1601 = vmatprep.mubr.f32.mxu1 %v795_v20  ;;  %1717 = vmatprep.subr.bf16.mxu1 %v1668_v18 }
  0x47   :  { %1518 = vmatmul.mubr.f32.gmra.mrb[2].mxu0 %v170_v22  ;;  %1602 = vmatmul.mubr.f32.gmra.mrb[2].mxu1 %v805_v25 }
  0x48   :  { %1671 = vmatpush3.bf16.msra.mxu0 %v1668_v18  ;;  %1719 = vmatpush3.bf16.msra.mxu1 %v1668_v18 }
  0x49   :  { %1528 = vmatprep.mubr.f32.mxu0 %v1887_v23  ;;  %1673 = vmatprep.subr.msk.bf16.mxu0 %vm1861_vm6, %v1826_v15 }
  0x4a   :  { %1612 = vmatprep.mubr.f32.mxu1 %v1889_v24  ;;  %1721 = vmatprep.subr.msk.bf16.mxu1 %vm1861_vm6, %v1826_v15 }
  0x4b   :  { %1529 = vmatmul.mubr.f32.vlgmr.msra.gmra.mrb[0].mxu0 %v1901_v30  ;;  %1613 = vmatmul.mubr.f32.vlgmr.msra.gmra.mrb[0].mxu1 %v1903_v31 }
  0x4c   :  { %1675 = vmatpush3.bf16.msk.msra.mxu0 %vm1861_vm6, %v1826_v15  ;;  %1723 = vmatpush3.bf16.msk.msra.mxu1 %vm1861_vm6, %v1826_v15 }
  0x4d   :  { %1531 = vmatprep.mubr.f32.mxu0 %v1934_v42  ;;  %1677 = vmatprep.subr.msk.bf16.mxu0 %vm1871_vm7, %v1826_v15 }
  0x4e   :  { %1615 = vmatprep.mubr.f32.mxu1 %v1965_v3  ;;  %1725 = vmatprep.subr.msk.bf16.mxu1 %vm1871_vm7, %v1826_v15 }
  0x4f   :  { %1532 = vmatmul.mubr.f32.gmra.mrb[2].mxu0 %v1972_v9  ;;  %1616 = vmatmul.mubr.f32.gmra.mrb[2].mxu1 %v1974_v10 }
  0x50   :  { %1679 = vmatpush3.bf16.msk.msra.mxu0 %vm1871_vm7, %v1826_v15  ;;  %1727 = vmatpush3.bf16.msk.msra.mxu1 %vm1871_vm7, %v1826_v15 }
  0x51   :  { %1542 = vmatprep.mubr.f32.mxu0 %v1887_v23  ;;  %1626 = vmatprep.mubr.f32.mxu1 %v1889_v24 }
  0x53   :  { %1543 = vmatmul.mubr.f32.vlgmr.msra.gmra.mrb[0].mxu0 %v1901_v30  ;;  %1627 = vmatmul.mubr.f32.vlgmr.msra.gmra.mrb[0].mxu1 %v1903_v31 }
  0x54   :  { %1545 = vmatprep.mubr.f32.mxu0 %v1934_v42  ;;  %1629 = vmatprep.mubr.f32.mxu1 %v1965_v3 }
  0x57   :  { %1546 = vmatmul.mubr.f32.gmra.mrb[2].mxu0 %v1972_v9  ;;  %1630 = vmatmul.mubr.f32.gmra.mrb[2].mxu1 %v1974_v10 }
 0x126   :  { %v1544_v8 = vpop.f32.mrb[0].mxu0  ;;  %v1628_v19 = vpop.f32.mrb[0].mxu1 }
 0x127   :  { %684 = vst.msk [vmem:[#allocation5 + $0x18] sm:$0xff] %vm43_vm0, %v1544_v8  ;;  %1320 = vst.msk [vmem:[#allocation5 + $0x58] sm:$0xff] %vm43_vm0, %v1628_v19  ;;  %v661_v15 = vpop.f32.mrb[1].mxu0  ;;  %v1296_v16 = vpop.f32.mrb[1].mxu1 }
 0x128   :  { %683 = vst.msk [vmem:[#allocation5 + $0x10] sm:$0xff] %vm43_vm0, %v661_v15  ;;  %1319 = vst.msk [vmem:[#allocation5 + $0x50] sm:$0xff] %vm43_vm0, %v1296_v16 }
 0x12a   :  { %v1547_v23 = vpop.f32.mrb[2].mxu0  ;;  %v1631_v24 = vpop.f32.mrb[2].mxu1 }
 0x12b   :  { %686 = vst.msk [vmem:[#allocation5 + $0x28] sm:$0xff] %vm43_vm0, %v1547_v23  ;;  %1322 = vst.msk [vmem:[#allocation5 + $0x68] sm:$0xff] %vm43_vm0, %v1631_v24  ;;  %v673_v28 = vpop.f32.mrb[3].mxu0  ;;  %v1308_v29 = vpop.f32.mrb[3].mxu1 }
 0x12c   :  { %685 = vst.msk [vmem:[#allocation5 + $0x20] sm:$0xff] %vm43_vm0, %v673_v28  ;;  %1321 = vst.msk [vmem:[#allocation5 + $0x60] sm:$0xff] %vm43_vm0, %v1308_v29 }
 0x12d   :  { %1807 = shalt.err (!%p1804_p12)
}
 0x12e   :  { %s1808_s24 = scalar_lea.hbm %s2117_s1, 2048 }
 0x12f   :  { %p1809_p13 = scmp.ne.s32.totalorder %s2117_s1, %s1808_s24  ;;  %p1812_p0 = scmp.lt.u32.totalorder %s1808_s24, %s2117_s1 }
 0x131   :  { %p1814_p1 = pnand %p1812_p0, %p1809_p13 }
 0x133   :  { %1817 = shalt.err (!%p1814_p1)
}
 0x134   :  { %1334 = dma.vmem_to_hbm [thread:$0]  %s1329_s20, 2048, %s2117_s1, [#allocation4], %s1823_s16, %s1823_s16, %s1824_s17  }
 0x135   :  { %1820 = dma.done.wait [#allocation4], 2048  }
 0x136   :  { %1821 = vsyncadd [#allocation4], 4294965248 }
 0x137   :  { %1338 = vsyncpa [#allocation3], 1 }
 0x138   :  { %1339 = vsyncpa [#allocation4], 1 }

</bundles_post_ra>
